<compile_context>
chip_gen: v7x
topology: tpu7x:2x2x1
jax: 0.10.0
libtpu: 0.0.40
codegen_flags: <defaults>
</compile_context>

<pallas_src>
import functools

import jax
import jax.numpy as jnp
from jax.experimental import pallas as pl
from jax.experimental.pallas import tpu as pltpu

# ----- small, TPU-friendly config (consistent with the module's structure) ---
CFG = dict(
    vocab_size=512,      # small stand-in for 50257
    context_length=64,   # small stand-in for 1024
    emb_dim=128,         # small stand-in for 768
    n_layers=2,          # DummyTransformerBlock = identity, count irrelevant
    drop_rate=0.1,       # dropout is identity at inference
)

BATCH = 2
SEQ = 8

TN = 512                              # vocab tile: lane-dense, >= MXU width
TM_FALLBACK = 256                     # row tile if activations can't stay resident
X_RESIDENT_BUDGET = 8 * 1024 * 1024   # bf16 activation bytes allowed resident in VMEM


def out_head_kernel(x_ref, w_ref, o_ref):
    # x_ref: (TM, E) bf16 ; w_ref: (E, TN) bf16 ; o_ref: (TM, TN) out dtype
    # Single MXU push per tile, f32 accumulate, cast on store.
    o_ref[...] = jnp.dot(
        x_ref[...], w_ref[...], preferred_element_type=jnp.float32
    ).astype(o_ref.dtype)


def prepare_out_head(out_head_w):
    """One-time parameter prep: nn.Linear weight (V, E) f32 -> (E, V) bf16.

    Done once at init so the jitted forward never re-reads / re-casts the
    full weight from HBM per call.
    """
    return out_head_w.T.astype(jnp.bfloat16)


@functools.partial(jax.jit, static_argnames=("out_dtype",))
def dummy_gpt_forward(in_idx, tok_emb_table, pos_emb_table, out_head_w_t,
                      out_dtype=jnp.float32):
    """in_idx: (B, T) int32. out_head_w_t: (E, V) bf16 (pre-prepared).

    Returns logits (B, T, V) in `out_dtype` (f32 default; bf16 halves the
    logits writeback stream, the dominant HBM term on v6e at real size).
    """
    B, T = in_idx.shape
    E = tok_emb_table.shape[1]
    V = out_head_w_t.shape[1]
    M = B * T

    # Embedding gather + broadcast positional add (fused by XLA).  Dropout /
    # DummyTransformerBlocks / DummyLayerNorm are identity in eval mode.
    # TODO(synk): nn.Dropout(drop_rate) is stochastic in train mode; treated as
    # identity (eval-mode semantics) for determinism.
    x = tok_emb_table[in_idx] + pos_emb_table[:T][None, :, :]    # (B, T, E) f32
    x = x.reshape(M, E).astype(jnp.bfloat16)                     # MXU-friendly

    n_v = pl.cdiv(V, TN)

    if M * E * 2 <= X_RESIDENT_BUDGET:
        # Activations fully VMEM-resident; weight streams exactly once over
        # the vocab axis.  Single grid axis -> shards across TCs on v7x.
        grid = (n_v,)
        in_specs = [
            pl.BlockSpec((M, E), lambda j: (0, 0)),    # resident activations
            pl.BlockSpec((E, TN), lambda j: (0, j)),   # weight columns (streamed)
        ]
        out_specs = pl.BlockSpec((M, TN), lambda j: (0, j))
        dims = ("parallel",)
    else:
        # Fallback for very large M: 2-D grid with the vocab/weight axis
        # OUTER so the weight block index is constant across the inner row
        # axis (re-stream the small activations, never the big weight).
        grid = (n_v, pl.cdiv(M, TM_FALLBACK))
        in_specs = [
            pl.BlockSpec((TM_FALLBACK, E), lambda j, i: (i, 0)),
            pl.BlockSpec((E, TN), lambda j, i: (0, j)),
        ]
        out_specs = pl.BlockSpec((TM_FALLBACK, TN), lambda j, i: (i, j))
        dims = ("parallel", "parallel")

    logits_flat = pl.pallas_call(
        out_head_kernel,
        out_shape=jax.ShapeDtypeStruct((M, V), out_dtype),   # exact shape, no pad/slice
        grid_spec=pltpu.PrefetchScalarGridSpec(
            num_scalar_prefetch=0,
            grid=grid,
            in_specs=in_specs,
            out_specs=out_specs,
        ),
        compiler_params=pltpu.CompilerParams(dimension_semantics=dims),
    )(x, out_head_w_t)

    return logits_flat.reshape(B, T, V)


def init_params(key, cfg):
    k_tok, k_pos, k_head = jax.random.split(key, 3)
    tok_emb = 0.02 * jax.random.normal(
        k_tok, (cfg["vocab_size"], cfg["emb_dim"]), dtype=jnp.float32)
    pos_emb = 0.02 * jax.random.normal(
        k_pos, (cfg["context_length"], cfg["emb_dim"]), dtype=jnp.float32)
    # nn.Linear(emb_dim, vocab_size, bias=False) -> weight shape (vocab, emb)
    out_head = 0.02 * jax.random.normal(
        k_head, (cfg["vocab_size"], cfg["emb_dim"]), dtype=jnp.float32)
    return tok_emb, pos_emb, out_head


if __name__ == "__main__":
    key = jax.random.PRNGKey(0)
    k_params, k_idx = jax.random.split(key)

    tok_emb, pos_emb, out_head = init_params(k_params, CFG)
    in_idx = jax.random.randint(
        k_idx, (BATCH, SEQ), minval=0, maxval=CFG["vocab_size"], dtype=jnp.int32)

    # One-time weight prep (transpose + bf16 cast) outside the jitted forward.
    out_head_t = prepare_out_head(out_head)                      # (E, V) bf16

    logits = dummy_gpt_forward(in_idx, tok_emb, pos_emb, out_head_t)
    logits = jax.block_until_ready(logits)

    # sanity check vs. pure-JAX f32 reference (bf16 MXU inputs -> loose tol)
    ref_x = tok_emb[in_idx] + pos_emb[:SEQ][None, :, :]
    ref_logits = ref_x @ out_head.T
    assert logits.shape == (BATCH, SEQ, CFG["vocab_size"])
    assert jnp.allclose(logits, ref_logits, atol=2e-3, rtol=2e-2), (
        float(jnp.max(jnp.abs(logits - ref_logits))))

    print("KERNEL_OK")
</pallas_src>

<mosaic_0001>
module attributes {stable_mosaic.version = 11 : i64} {
  func.func @out_head_kernel(%arg0: i32, %arg1: memref<16x128xbf16, #tpu.memory_space<vmem>>, %arg2: memref<128x512xbf16, #tpu.memory_space<vmem>>, %arg3: memref<16x512xf32, #tpu.memory_space<vmem>>) attributes {dimension_semantics = [#tpu.dimension_semantics<parallel>], iteration_bounds = array<i64: 1>, scalar_prefetch = 0 : i64, scratch_operands = 0 : i64, tpu.core_type = #tpu.core_type<tc>, window_params = [{pipeline_mode = #tpu.pipeline_mode<synchronous>, transform_indices = @transform_0, window_bounds = array<i64: 16, 128>}, {transform_indices = @transform_1, window_bounds = array<i64: 128, 512>}, {transform_indices = @transform_2, window_bounds = array<i64: 16, 512>}]} {
    %c0 = arith.constant 0 : index
    %c0_0 = arith.constant 0 : index
    %0 = vector.load %arg1[%c0, %c0_0] : memref<16x128xbf16, #tpu.memory_space<vmem>>, vector<16x128xbf16>
    %c0_1 = arith.constant 0 : index
    %c0_2 = arith.constant 0 : index
    %1 = vector.load %arg2[%c0_1, %c0_2] : memref<128x512xbf16, #tpu.memory_space<vmem>>, vector<128x512xbf16>
    %cst = arith.constant dense<0.000000e+00> : vector<16x512xf32>
    %2 = tpu.matmul %0, %1, %cst {dimension_numbers = #tpu.dot_dimension_numbers<[1], [0], [0], [1], [0, 0, 1, 1], [], []>} : vector<16x128xbf16>, vector<128x512xbf16>, vector<16x512xf32> -> vector<16x512xf32>
    %c0_3 = arith.constant 0 : index
    %c0_4 = arith.constant 0 : index
    %3 = vector.load %arg3[%c0_3, %c0_4] : memref<16x512xf32, #tpu.memory_space<vmem>>, vector<16x512xf32>
    tpu.vector_store %arg3[%c0_3, %c0_4], %2 {strides = array<i32>} : memref<16x512xf32, #tpu.memory_space<vmem>>, vector<16x512xf32>,
    return
  }
  func.func @transform_0(%arg0: i32) -> (i32, i32) {
    %c0_i32 = arith.constant 0 : i32
    %c0_i32_0 = arith.constant 0 : i32
    %c0_i32_1 = arith.constant 0 : i32
    return %c0_i32, %c0_i32_0 : i32, i32
  }
  func.func @transform_1(%arg0: i32) -> (i32, i32) {
    %c0_i32 = arith.constant 0 : i32
    %c0_i32_0 = arith.constant 0 : i32
    return %c0_i32, %arg0 : i32, i32
  }
  func.func @transform_2(%arg0: i32) -> (i32, i32) {
    %c0_i32 = arith.constant 0 : i32
    %c0_i32_0 = arith.constant 0 : i32
    return %c0_i32, %arg0 : i32, i32
  }
}

</mosaic_0001>

<bundles_post_ra>
// kernel: dummy_gpt_forward.1
= control target key start
LH: loop header
LB: loop body
LE: loop exit
PB: predicated region body
PF: predicated region fallthrough
CT: control target
= control target key end

     0   :  { %7 = vsyncpa [#allocation3], 0  ;;  %s524_s0 = inlined_call_operand.vmem [shape: bf16[16,128], index: 0, kind: input, shape index: {}]   ;;  %s525_s1 = inlined_call_operand.hbm [shape: bf16[128,512], index: 1, kind: input, shape index: {}]   ;;  %s526_s2 = inlined_call_operand.hbm [shape: f32[16,512], index: 2, kind: output, shape index: {}]  }
   0x1   :  { %8 = vsyncpa [#allocation4], 0  ;;  %s475_s9 = smov [#allocation2]   ;;  %s427_s13 = scalar_lea.hbm %s525_s1, 4096 }
   0x2   :  { %s16_s10 = sshll.u32 %s475_s9, 4  ;;  %p428_p0 = scmp.ne.s32.totalorder %s525_s1, %s427_s13  ;;  %s17_s10 = int_to_ptr.vmem [resolvable:$true] %s16_s10 }
   0x3   :  { %p431_p1 = scmp.lt.u32.totalorder %s427_s13, %s525_s1 }
   0x5   :  { %p433_p2 = pnand %p431_p1, %p428_p0 }
   0x7   :  { %436 = shalt.err (!%p433_p2)
}
   0x8   :  { %s437_s18 = scalar_lea.vmem %s17_s10, 4096  ;;  %p442_p4 = scmp.lt.s32.totalorder %s17_s10, %s17_s10 }
   0x9   :  { %p438_p3 = scmp.ne.s32.totalorder %s17_s10, %s437_s18  ;;  %p443_p5 = scmp.lt.s32.totalorder %s437_s18, %s437_s18 }
   0xb   :  { %p444_p6 = por %p443_p5, %p442_p4 }
   0xd   :  { %p445_p7 = pnand %p444_p6, %p438_p3 }
   0xf   :  { %448 = shalt.err (!%p445_p7)
}
  0x10   :  { %s476_s19 = smov 256   ;;  %s477_s20 = smov 16  }
  0x11   :  { %22 = dma.hbm_to_vmem [thread:$0]  %s525_s1, 4096, %s17_s10, [#allocation3], %s476_s19, %s476_s19, %s477_s20  }
  0x12   :  { %471 = dma.done.wait [#allocation3], 4096  }
  0x13   :  { %472 = vsyncadd [#allocation3], 4294963200  ;;  %v478_v0 = vmov 0   ;;  %v378_v1 = vld [vmem:[#allocation2 + $0x4] ss:$16 sps:$4 sm:$0xff]   ;;  %s479_s24 = smov [#allocation5]  }
  0x14   :  { %259 = vmatprep.mubr.bf16.mxu0 %v478_v0  ;;  %302 = vmatprep.mubr.bf16.mxu1 %v478_v0  ;;  %v380_v2 = vld [vmem:[#allocation2 + $0xc] ss:$16 sps:$4 sm:$0xff]   ;;  %v382_v3 = vld [vmem:[#allocation2] ss:$16 sps:$4 sm:$0xff]   ;;  %v383_v4 = vld [vmem:[#allocation2 + $0x8] ss:$16 sps:$4 sm:$0xff]  }
  0x15   :  { %227 = vmatprep.subr.bf16.mxu0 %v378_v1  ;;  %270 = vmatprep.subr.bf16.mxu1 %v380_v2  ;;  %v384_v5 = vld [vmem:[#allocation2 + $0x24] ss:$16 sps:$4 sm:$0xff]   ;;  %v386_v6 = vld [vmem:[#allocation2 + $0x2c] ss:$16 sps:$4 sm:$0xff]   ;;  %v388_v7 = vld [vmem:[#allocation2 + $0x20] ss:$16 sps:$4 sm:$0xff]  }
  0x16   :  { %228 = vmatpush1.bf16.msra.mxu0 %v382_v3  ;;  %271 = vmatpush1.bf16.msra.mxu1 %v383_v4  ;;  %v389_v8 = vld [vmem:[#allocation2 + $0x28] ss:$16 sps:$4 sm:$0xff]   ;;  %v390_v9 = vld [vmem:[#allocation2 + $0x44] ss:$16 sps:$4 sm:$0xff]   ;;  %v392_v10 = vld [vmem:[#allocation2 + $0x4c] ss:$16 sps:$4 sm:$0xff]  }
  0x17   :  { %229 = vmatprep.subr.bf16.mxu0 %v384_v5  ;;  %272 = vmatprep.subr.bf16.mxu1 %v386_v6  ;;  %v394_v11 = vld [vmem:[#allocation2 + $0x40] ss:$16 sps:$4 sm:$0xff]   ;;  %v395_v12 = vld [vmem:[#allocation2 + $0x48] ss:$16 sps:$4 sm:$0xff]   ;;  %v396_v13 = vld [vmem:[#allocation2 + $0x64] ss:$16 sps:$4 sm:$0xff]  }
  0x18   :  { %v398_v14 = vld [vmem:[#allocation2 + $0x6c] ss:$16 sps:$4 sm:$0xff]   ;;  %v400_v15 = vld [vmem:[#allocation2 + $0x60] ss:$16 sps:$4 sm:$0xff]   ;;  %v401_v16 = vld [vmem:[#allocation2 + $0x68] ss:$16 sps:$4 sm:$0xff]  }
  0x19   :  { %v402_v17 = vld [vmem:[#allocation2 + $0x84] ss:$16 sps:$4 sm:$0xff]   ;;  %v404_v18 = vld [vmem:[#allocation2 + $0x8c] ss:$16 sps:$4 sm:$0xff]   ;;  %v406_v19 = vld [vmem:[#allocation2 + $0x80] ss:$16 sps:$4 sm:$0xff]  }
  0x1a   :  { %230 = vmatpush1.bf16.msra.mxu0 %v388_v7  ;;  %273 = vmatpush1.bf16.msra.mxu1 %v389_v8  ;;  %v407_v20 = vld [vmem:[#allocation2 + $0x88] ss:$16 sps:$4 sm:$0xff]   ;;  %v408_v21 = vld [vmem:[#allocation2 + $0xa4] ss:$16 sps:$4 sm:$0xff]   ;;  %v410_v22 = vld [vmem:[#allocation2 + $0xac] ss:$16 sps:$4 sm:$0xff]  }
  0x1b   :  { %231 = vmatprep.subr.bf16.mxu0 %v390_v9  ;;  %274 = vmatprep.subr.bf16.mxu1 %v392_v10  ;;  %v412_v23 = vld [vmem:[#allocation2 + $0xa0] ss:$16 sps:$4 sm:$0xff]   ;;  %v413_v24 = vld [vmem:[#allocation2 + $0xa8] ss:$16 sps:$4 sm:$0xff]   ;;  %v414_v25 = vld [vmem:[#allocation2 + $0xc4] ss:$16 sps:$4 sm:$0xff]  }
  0x1c   :  { %v416_v26 = vld [vmem:[#allocation2 + $0xcc] ss:$16 sps:$4 sm:$0xff]   ;;  %v418_v27 = vld [vmem:[#allocation2 + $0xc0] ss:$16 sps:$4 sm:$0xff]   ;;  %v419_v28 = vld [vmem:[#allocation2 + $0xc8] ss:$16 sps:$4 sm:$0xff]  }
  0x1d   :  { %v420_v29 = vld [vmem:[#allocation2 + $0xe4] ss:$16 sps:$4 sm:$0xff]   ;;  %v422_v30 = vld [vmem:[#allocation2 + $0xec] ss:$16 sps:$4 sm:$0xff]   ;;  %v424_v31 = vld [vmem:[#allocation2 + $0xe0] ss:$16 sps:$4 sm:$0xff]  }
  0x1e   :  { %232 = vmatpush1.bf16.msra.mxu0 %v394_v11  ;;  %275 = vmatpush1.bf16.msra.mxu1 %v395_v12  ;;  %v425_v32 = vld [vmem:[#allocation2 + $0xe8] ss:$16 sps:$4 sm:$0xff]   ;;  %v426_v33 = vld [vmem:[%s524_s0] sm:$0xff]   ;;  %s326_s25 = sshll.u32 %s479_s24, 4  ;;  %s327_s25 = int_to_ptr.vmem [resolvable:$true] %s326_s25 }
  0x1f   :  { %233 = vmatprep.subr.bf16.mxu0 %v396_v13  ;;  %276 = vmatprep.subr.bf16.mxu1 %v398_v14  ;;  %s449_s0 = scalar_lea.vmem %s327_s25, 1024  ;;  %p454_p9 = scmp.lt.s32.totalorder %s327_s25, %s327_s25 }
  0x20   :  { %p450_p8 = scmp.ne.s32.totalorder %s327_s25, %s449_s0  ;;  %p455_p10 = scmp.lt.s32.totalorder %s449_s0, %s449_s0 }
  0x22   :  { %234 = vmatpush1.bf16.msra.mxu0 %v400_v15  ;;  %277 = vmatpush1.bf16.msra.mxu1 %v401_v16  ;;  %p456_p11 = por %p455_p10, %p454_p9 }
  0x23   :  { %235 = vmatprep.subr.bf16.mxu0 %v402_v17  ;;  %278 = vmatprep.subr.bf16.mxu1 %v404_v18 }
  0x24   :  { %p457_p12 = pnand %p456_p11, %p450_p8 }
  0x26   :  { %236 = vmatpush1.bf16.msra.mxu0 %v406_v19  ;;  %279 = vmatpush1.bf16.msra.mxu1 %v407_v20 }
  0x27   :  { %237 = vmatprep.subr.bf16.mxu0 %v408_v21  ;;  %280 = vmatprep.subr.bf16.mxu1 %v410_v22 }
  0x2a   :  { %238 = vmatpush1.bf16.msra.mxu0 %v412_v23  ;;  %281 = vmatpush1.bf16.msra.mxu1 %v413_v24 }
  0x2b   :  { %239 = vmatprep.subr.bf16.mxu0 %v414_v25  ;;  %282 = vmatprep.subr.bf16.mxu1 %v416_v26 }
  0x2e   :  { %240 = vmatpush1.bf16.msra.mxu0 %v418_v27  ;;  %283 = vmatpush1.bf16.msra.mxu1 %v419_v28 }
  0x2f   :  { %241 = vmatprep.subr.bf16.mxu0 %v420_v29  ;;  %284 = vmatprep.subr.bf16.mxu1 %v422_v30 }
  0x32   :  { %242 = vmatpush1.bf16.msra.mxu0 %v424_v31  ;;  %285 = vmatpush1.bf16.msra.mxu1 %v425_v32 }
  0x35   :  { %260 = vmatmul.mubr.bf16.vlgmr.msra.gmra.mrb[0].mxu0 %v426_v33  ;;  %303 = vmatmul.mubr.bf16.vlgmr.msra.gmra.mrb[0].mxu1 %v426_v33 }
 0x108   :  { %v261_v34 = vpop.f32.mrb[0].mxu0  ;;  %v304_v35 = vpop.f32.mrb[0].mxu1 }
 0x109   :  { %313 = vst [vmem:[#allocation5] sm:$0xff] %v261_v34  ;;  %315 = vst [vmem:[#allocation5 + $0x10] sm:$0xff] %v304_v35  ;;  %v263_v36 = vpop.f32.mrb[1].mxu0  ;;  %v306_v37 = vpop.f32.mrb[1].mxu1 }
 0x10a   :  { %314 = vst [vmem:[#allocation5 + $0x8] sm:$0xff] %v263_v36  ;;  %316 = vst [vmem:[#allocation5 + $0x18] sm:$0xff] %v306_v37  ;;  %v265_v38 = vpop.f32.mrb[2].mxu0  ;;  %v308_v39 = vpop.f32.mrb[2].mxu1 }
 0x10b   :  { %317 = vst [vmem:[#allocation5 + $0x20] sm:$0xff] %v265_v38  ;;  %319 = vst [vmem:[#allocation5 + $0x30] sm:$0xff] %v308_v39  ;;  %v267_v40 = vpop.f32.mrb[3].mxu0  ;;  %v310_v41 = vpop.f32.mrb[3].mxu1 }
 0x10c   :  { %318 = vst [vmem:[#allocation5 + $0x28] sm:$0xff] %v267_v40  ;;  %320 = vst [vmem:[#allocation5 + $0x38] sm:$0xff] %v310_v41 }
 0x10d   :  { %460 = shalt.err (!%p457_p12)
}
 0x10e   :  { %s461_s28 = scalar_lea.hbm %s526_s2, 1024 }
 0x10f   :  { %p462_p13 = scmp.ne.s32.totalorder %s526_s2, %s461_s28  ;;  %p465_p0 = scmp.lt.u32.totalorder %s461_s28, %s526_s2 }
 0x111   :  { %p467_p1 = pnand %p465_p0, %p462_p13 }
 0x113   :  { %470 = shalt.err (!%p467_p1)
}
 0x114   :  { %s480_s5 = smov 512   ;;  %s481_s6 = smov 32  }
 0x115   :  { %332 = dma.vmem_to_hbm [thread:$0]  %s327_s25, 1024, %s526_s2, [#allocation4], %s480_s5, %s480_s5, %s481_s6  }
 0x116   :  { %473 = dma.done.wait [#allocation4], 1024  }
 0x117   :  { %474 = vsyncadd [#allocation4], 4294966272 }
 0x118   :  { %336 = vsyncpa [#allocation3], 1 }
 0x119   :  { %337 = vsyncpa [#allocation4], 1 }

</bundles_post_ra>
